<compile_context>
chip_gen: v5e
topology: v5e:2x2
jax: 0.10.0
libtpu: 0.0.40
codegen_flags: <defaults>
</compile_context>

<pallas_src>
import functools

import jax
import jax.numpy as jnp
from jax import lax
from jax.experimental import pallas as pl
from jax.experimental.pallas import tpu as pltpu


def _focal_loss_kernel(*refs, n, gamma, has_weight):
    """Per-tile focal-loss partial sums.

    Inputs/outputs (in order):
      has_weight=False: x_ref [TN,C], tgt_ref [TN,1] -> num_ref [1,1]
      has_weight=True : x_ref, tgt_ref, w_ref [1,C] -> num_ref [1,1], den_ref [1,1]
    """
    if has_weight:
        x_ref, tgt_ref, w_ref, num_ref, den_ref = refs
    else:
        x_ref, tgt_ref, num_ref = refs
        w_ref = den_ref = None

    x = x_ref[...].astype(jnp.float32)             # [TN, C]
    tn, c = x.shape

    # Numerically-stable log-sum-exp along the class (lane) axis.  The lane
    # axis is the full logical C extent, so no explicit column mask is needed.
    m = jnp.max(x, axis=1, keepdims=True)          # [TN, 1]
    s = jnp.sum(jnp.exp(x - m), axis=1, keepdims=True)
    lse = m + jnp.log(s)                           # [TN, 1]

    # Gather x[row, target[row]] with a one-hot compare + lane sum.
    tgt = tgt_ref[...]                             # [TN, 1] int32
    col_ids = lax.broadcasted_iota(jnp.int32, (tn, c), 1)
    onehot = col_ids == tgt                        # [TN, C] bool
    x_t = jnp.sum(jnp.where(onehot, x, 0.0), axis=1, keepdims=True)

    # Focal modulation only on the [TN, 1] target column (no full-width exp).
    logpt_t = x_t - lse                            # log_softmax at target class
    pt_t = jnp.exp(logpt_t)
    one_minus = 1.0 - pt_t
    if isinstance(gamma, int) and gamma >= 0:      # gamma=2 -> plain VPU multiplies
        focal = jnp.ones_like(one_minus)
        for _ in range(gamma):
            focal = focal * one_minus
    else:
        focal = jnp.power(one_minus, jnp.float32(gamma))
    nll_t = -(focal * logpt_t)                     # per-row focal NLL, [TN, 1]

    # Mask rows past N in the (possibly ragged) last tile, then reduce.
    row_ids = (lax.broadcasted_iota(jnp.int32, (tn, 1), 0)
               + pl.program_id(0) * tn)
    valid = row_ids < n

    if has_weight:
        w = w_ref[...].astype(jnp.float32)         # [1, C]
        w_t = jnp.sum(jnp.where(onehot, w, 0.0), axis=1, keepdims=True)  # [TN, 1]
        num_ref[...] = jnp.reshape(jnp.sum(jnp.where(valid, w_t * nll_t, 0.0)), (1, 1))
        den_ref[...] = jnp.reshape(jnp.sum(jnp.where(valid, w_t, 0.0)), (1, 1))
    else:
        num_ref[...] = jnp.reshape(jnp.sum(jnp.where(valid, nll_t, 0.0)), (1, 1))


def focal_loss(logits, target, gamma=2, weight=None, block_n=512):
    """logits: [N, C] float, target: [N] int, weight: optional [C] float -> scalar loss."""
    n, c = logits.shape

    if n <= block_n:
        tn = n                                     # full extent: no alignment needed
    else:
        # Sublane alignment: 8 for 32-bit dtypes, 16/32 for narrower packing.
        itemsize = logits.dtype.itemsize
        align = 8 if itemsize >= 4 else (16 if itemsize == 2 else 32)
        tn = max(align, (block_n // align) * align)
    num_tiles = pl.cdiv(n, tn)

    tgt2 = target.astype(jnp.int32).reshape(n, 1)
    has_weight = weight is not None

    kernel = functools.partial(_focal_loss_kernel, n=n, gamma=gamma,
                               has_weight=has_weight)

    in_specs = [
        pl.BlockSpec((tn, c), lambda i: (i, 0)),
        pl.BlockSpec((tn, 1), lambda i: (i, 0)),
    ]
    inputs = [logits, tgt2]
    if has_weight:
        w2 = jnp.asarray(weight, dtype=jnp.float32).reshape(1, c)
        in_specs.append(pl.BlockSpec((1, c), lambda i: (0, 0)))
        inputs.append(w2)
        out_shape = (jax.ShapeDtypeStruct((num_tiles, 1), jnp.float32),
                     jax.ShapeDtypeStruct((num_tiles, 1), jnp.float32))
        out_specs = (pl.BlockSpec((1, 1), lambda i: (i, 0)),
                     pl.BlockSpec((1, 1), lambda i: (i, 0)))
    else:
        out_shape = jax.ShapeDtypeStruct((num_tiles, 1), jnp.float32)
        out_specs = pl.BlockSpec((1, 1), lambda i: (i, 0))

    result = pl.pallas_call(
        kernel,
        out_shape=out_shape,
        grid=(num_tiles,),
        in_specs=in_specs,
        out_specs=out_specs,
        compiler_params=pltpu.CompilerParams(
            dimension_semantics=("parallel",)),
        cost_estimate=pl.CostEstimate(
            flops=int(10 * n * c),
            transcendentals=int(n * c + 2 * n),
            bytes_accessed=int(n * c * logits.dtype.itemsize + 4 * n
                               + (4 * c if has_weight else 0)
                               + 8 * num_tiles),
        ),
    )(*inputs)

    # Tiny final reduction in the wrapper (mean or weighted mean).
    if has_weight:
        num, den = result
        return jnp.sum(num) / jnp.sum(den)
    return jnp.sum(result) / jnp.float32(n)


def _focal_loss_ref(logits, target, gamma=2, weight=None):
    """Pure-JAX reference matching the PyTorch module."""
    logpt = jax.nn.log_softmax(logits.astype(jnp.float32), axis=1)
    pt = jnp.exp(logpt)
    mod = (1.0 - pt) ** gamma * logpt
    picked = jnp.take_along_axis(
        mod, target[:, None].astype(jnp.int32), axis=1)[:, 0]
    if weight is None:
        return -jnp.mean(picked)
    w_t = jnp.asarray(weight, jnp.float32)[target]
    return jnp.sum(-picked * w_t) / jnp.sum(w_t)


if __name__ == "__main__":
    key = jax.random.PRNGKey(0)
    k_logits, k_target, k_weight = jax.random.split(key, 3)

    # Case 1: small single-tile, weight=None.
    N, C = 8, 10
    logits = jax.random.normal(k_logits, (N, C), dtype=jnp.float32)
    target = jax.random.randint(k_target, (N,), 0, C, dtype=jnp.int32)
    loss = jax.block_until_ready(focal_loss(logits, target, gamma=2))
    ref = _focal_loss_ref(logits, target, gamma=2)
    assert jnp.allclose(loss, ref, rtol=1e-5, atol=1e-5), (loss, ref)

    # Case 2: multi-tile with ragged last tile (exercises tiling + row mask).
    N2, C2 = 20, 10
    logits2 = jax.random.normal(k_logits, (N2, C2), dtype=jnp.float32)
    target2 = jax.random.randint(k_target, (N2,), 0, C2, dtype=jnp.int32)
    loss2 = jax.block_until_ready(focal_loss(logits2, target2, gamma=2, block_n=8))
    ref2 = _focal_loss_ref(logits2, target2, gamma=2)
    assert jnp.allclose(loss2, ref2, rtol=1e-5, atol=1e-5), (loss2, ref2)

    # Case 3: per-class weight (F.nll_loss weighted mean), multi-tile.
    w = jax.random.uniform(k_weight, (C2,), dtype=jnp.float32) + 0.5
    loss3 = jax.block_until_ready(
        focal_loss(logits2, target2, gamma=2, weight=w, block_n=8))
    ref3 = _focal_loss_ref(logits2, target2, gamma=2, weight=w)
    assert jnp.allclose(loss3, ref3, rtol=1e-5, atol=1e-5), (loss3, ref3)

    print("KERNEL_OK")
</pallas_src>

<mosaic_0001>
module attributes {stable_mosaic.version = 11 : i64} {
  func.func @_focal_loss_kernel(%arg0: i32, %arg1: memref<8x10xf32, #tpu.memory_space<vmem>>, %arg2: memref<8x1xi32, #tpu.memory_space<vmem>>, %arg3: memref<1x1xf32, #tpu.memory_space<vmem>>) attributes {dimension_semantics = [#tpu.dimension_semantics<parallel>], iteration_bounds = array<i64: 1>, scalar_prefetch = 0 : i64, scratch_operands = 0 : i64, tpu.core_type = #tpu.core_type<tc>, window_params = [{transform_indices = @transform_0, window_bounds = array<i64: 8, 10>}, {transform_indices = @transform_1, window_bounds = array<i64: 8, 1>}, {transform_indices = @transform_2, window_bounds = array<i64: 1, 1>}]} {
    %c0 = arith.constant 0 : index
    %c0_0 = arith.constant 0 : index
    %0 = vector.load %arg1[%c0, %c0_0] : memref<8x10xf32, #tpu.memory_space<vmem>>, vector<8x10xf32>
    %cst = arith.constant dense<0xFF800000> : vector<8xf32>
    %1 = vector.multi_reduction <maximumf>, %0, %cst [1] : vector<8x10xf32> to vector<8xf32>
    %2 = vector.shape_cast %1 : vector<8xf32> to vector<8x1xf32>
    %3 = vector.broadcast %2 : vector<8x1xf32> to vector<8x10xf32>
    %4 = arith.subf %0, %3 : vector<8x10xf32>
    %5 = math.exp %4 : vector<8x10xf32>
    %cst_1 = arith.constant dense<0.000000e+00> : vector<8xf32>
    %6 = vector.multi_reduction <add>, %5, %cst_1 [1] : vector<8x10xf32> to vector<8xf32>
    %7 = vector.shape_cast %6 : vector<8xf32> to vector<8x1xf32>
    %8 = math.log %7 : vector<8x1xf32>
    %9 = arith.addf %2, %8 : vector<8x1xf32>
    %c0_2 = arith.constant 0 : index
    %c0_3 = arith.constant 0 : index
    %10 = vector.load %arg2[%c0_2, %c0_3] : memref<8x1xi32, #tpu.memory_space<vmem>>, vector<8x1xi32>
    %11 = tpu.iota {dimensions = array<i32: 1>} : vector<8x10xi32>
    %12 = vector.broadcast %10 : vector<8x1xi32> to vector<8x10xi32>
    %13 = arith.cmpi eq, %11, %12 : vector<8x10xi32>
    %cst_4 = arith.constant 0.000000e+00 : f32
    %14 = vector.broadcast %cst_4 : f32 to vector<8x10xf32>
    %15 = arith.select %13, %0, %14 : vector<8x10xi1>, vector<8x10xf32>
    %cst_5 = arith.constant dense<0.000000e+00> : vector<8xf32>
    %16 = vector.multi_reduction <add>, %15, %cst_5 [1] : vector<8x10xf32> to vector<8xf32>
    %17 = vector.shape_cast %16 : vector<8xf32> to vector<8x1xf32>
    %18 = arith.subf %17, %9 : vector<8x1xf32>
    %19 = math.exp %18 : vector<8x1xf32>
    %cst_6 = arith.constant 1.000000e+00 : f32
    %20 = vector.broadcast %cst_6 : f32 to vector<8x1xf32>
    %21 = arith.subf %20, %19 : vector<8x1xf32>
    %cst_7 = arith.constant 1.000000e+00 : f32
    %22 = vector.broadcast %cst_7 : f32 to vector<8x1xf32>
    %23 = arith.mulf %22, %21 : vector<8x1xf32>
    %24 = arith.mulf %23, %21 : vector<8x1xf32>
    %25 = arith.mulf %24, %18 : vector<8x1xf32>
    %cst_8 = arith.constant 0.000000e+00 : f32
    %26 = vector.broadcast %cst_8 : f32 to vector<8x1xf32>
    %27 = arith.subf %26, %25 : vector<8x1xf32>
    %28 = tpu.iota {dimensions = array<i32: 0>} : vector<8x1xi32>
    %c8_i32 = arith.constant 8 : i32
    %29 = arith.muli %arg0, %c8_i32 : i32
    %30 = vector.broadcast %29 : i32 to vector<8x1xi32>
    %31 = arith.addi %28, %30 : vector<8x1xi32>
    %c8_i32_9 = arith.constant 8 : i32
    %32 = vector.broadcast %c8_i32_9 : i32 to vector<8x1xi32>
    %33 = arith.cmpi slt, %31, %32 : vector<8x1xi32>
    %cst_10 = arith.constant 0.000000e+00 : f32
    %34 = vector.broadcast %cst_10 : f32 to vector<8x1xf32>
    %35 = arith.select %33, %27, %34 : vector<8x1xi1>, vector<8x1xf32>
    %36 = vector.shape_cast %35 : vector<8x1xf32> to vector<1x8x1xf32>
    %cst_11 = arith.constant dense<0.000000e+00> : vector<1xf32>
    %37 = vector.multi_reduction <add>, %36, %cst_11 [1, 2] : vector<1x8x1xf32> to vector<1xf32>
    %38 = vector.shape_cast %37 : vector<1xf32> to vector<1x1x1xf32>
    %39 = vector.extract %38[0, 0, 0] : f32 from vector<1x1x1xf32>
    %40 = vector.broadcast %39 : f32 to vector<1x1xf32>
    %c0_12 = arith.constant 0 : index
    %c0_13 = arith.constant 0 : index
    %41 = vector.load %arg3[%c0_12, %c0_13] : memref<1x1xf32, #tpu.memory_space<vmem>>, vector<1x1xf32>
    tpu.vector_store %arg3[%c0_12, %c0_13], %40 {strides = array<i32>} : memref<1x1xf32, #tpu.memory_space<vmem>>, vector<1x1xf32>,
    return
  }
  func.func @transform_0(%arg0: i32) -> (i32, i32) {
    %c0_i32 = arith.constant 0 : i32
    %c0_i32_0 = arith.constant 0 : i32
    return %arg0, %c0_i32 : i32, i32
  }
  func.func @transform_1(%arg0: i32) -> (i32, i32) {
    %c0_i32 = arith.constant 0 : i32
    %c0_i32_0 = arith.constant 0 : i32
    return %arg0, %c0_i32 : i32, i32
  }
  func.func @transform_2(%arg0: i32) -> (i32, i32) {
    %c0_i32 = arith.constant 0 : i32
    %c0_i32_0 = arith.constant 0 : i32
    return %arg0, %c0_i32 : i32, i32
  }
}

</mosaic_0001>

<bundles_post_ra>
// kernel: tpu_custom_call.1
= control target key start
LH: loop header
LB: loop body
LE: loop exit
PB: predicated region body
PF: predicated region fallthrough
CT: control target
= control target key end

     0   :  { %vm13_vm0 = vcmask 80896   ;;  %s147_s0 = inlined_call_operand.vmem [shape: f32[8,10], index: 0, kind: input, shape index: {}]   ;;  %s148_s1 = inlined_call_operand.vmem [shape: s32[8,1], index: 1, kind: input, shape index: {}]   ;;  %s149_s2 = inlined_call_operand.hbm [shape: f32[1,1], index: 2, kind: output, shape index: {}]  }
   0x1   :  { %v12_v0 = vld [vmem:[%s147_s0] sm:$0xff] }
   0x2   :  { %7 = vsyncpa [#allocation3], 0  ;;  %v14_v1 = vsel %vm13_vm0, %v12_v0, -inf  ;;  %v118_v2 = vmov 0   ;;  %v26_v3 = vld [vmem:[%s148_s1] sm:$0xff]  ;;  %v27_v9 = vlaneseq  ;;  %vm51_vm2 = vcmask 7168  }
   0x3   :  { %85 = vset.pattern.permute.xlu0 %v118_v2  ;;  %s119_s0 = smov [#allocation2]   ;;  %s72_s15 = sshll.u32 %s149_s2, 4  ;;  %vm63_vm3 = vcmask 0   ;;  %s73_s15 = int_to_ptr.hbm [resolvable:$true] %s72_s15 }
   0x4   :  { %15 = vmax.xlane.f32.xlu0 %v14_v1  ;;  %v28_v10 = vand.u32 127, %v27_v9  ;;  %s70_s1 = sshll.u32 %s119_s0, 4  ;;  %s71_s1 = int_to_ptr.vmem [resolvable:$true] %s70_s1 }
  0x18   :  { %30 = vperm.xlu0 %85, %v26_v3  }
  0x77   :  { %v16_v4 = vpop.xlane.xlu0 %15 }
  0x78   :  { %v17_v5 = vsub.f32 %v12_v0, %v16_v4 }
  0x7a   :  { %v18_v6 = vmul.f32 1.442695, %v17_v5 }
  0x7c   :  { %86 = vpow2.f32 %v18_v6 }
  0x82   :  { %v87_v7 = vpop.eup %86 }
  0x83   :  { %v20_v8 = vsel %vm13_vm0, %v87_v7, 0.0 }
  0x84   :  { %21 = vadd.xlane.f32.xlu1 %v20_v8 }
  0x8a   :  { %v31_v11 = vpop.permute.xlu0 %30 }
  0x8b   :  { %vm32_vm1 = vcmp.eq.s32.totalorder %v28_v10, %v31_v11 }
  0x8c   :  { %v33_v12 = vsel %vm32_vm1, %v12_v0, 0.0 }
  0x8d   :  { %v34_v13 = vsel %vm13_vm0, %v33_v12, 0.0 }
  0x8e   :  { %35 = vadd.xlane.f32.xlu1 %v34_v13 }
  0xf7   :  { %v22_v14 = vpop.xlane.xlu1 %21 }
  0xf8   :  { %88 = vlog2.f32 %v22_v14 }
  0xfe   :  { %v89_v15 = vpop.eup %88 }
  0xff   :  { %v24_v16 = vmul.f32 0.6931472, %v89_v15 }
 0x101   :  { %v25_v17 = vadd.f32 %v24_v16, %v16_v4  ;;  %v36_v18 = vpop.xlane.xlu1 %35 }
 0x103   :  { %v37_v19 = vsub.f32 %v36_v18, %v25_v17 }
 0x105   :  { %v38_v20 = vmul.f32 1.442695, %v37_v19 }
 0x107   :  { %90 = vpow2.f32 %v38_v20 }
 0x10d   :  { %v91_v21 = vpop.eup %90 }
 0x10e   :  { %v40_v22 = vsub.f32 1.0, %v91_v21 }
 0x110   :  { %v41_v23 = vmul.f32 %v40_v22, %v40_v22 }
 0x112   :  { %v42_v24 = vmul.f32 %v41_v23, %v37_v19 }
 0x114   :  { %v43_v25 = vsub.f32 0.0, %v42_v24 }
 0x116   :  { %v52_v26 = vsel %vm51_vm2, %v43_v25, 0.0 }
 0x117   :  { %53 = vadd.xlane.f32.xlu2 %v52_v26 }
 0x18a   :  { %v54_v27 = vpop.xlane.xlu2 %53 }
 0x18b   :  { %v55_v28 = vrot.slane %v54_v27, 4 }
 0x18d   :  { %v56_v29 = vadd.f32 %v55_v28, %v54_v27 }
 0x18f   :  { %v57_v30 = vrot.slane %v56_v29, 2 }
 0x191   :  { %v58_v31 = vadd.f32 %v57_v30, %v56_v29 }
 0x193   :  { %v59_v32 = vrot.slane %v58_v31, 1 }
 0x195   :  { %v60_v33 = vadd.f32 %v59_v32, %v58_v31 }
 0x197   :  { %81 = vpush %v60_v33 }
 0x1c8   :  { %s82_s16 = spop %81 }
 0x1c9   :  { %v62_v34 = vstv %s82_s16 }
 0x1ca   :  { %64 = vst.msk [vmem:[#allocation2] sm:$0x1] %vm63_vm3, %v62_v34 }
 0x1cb   :  { %75 = dma.vmem_to_hbm [thread:$0]  %s71_s1, 16, %s73_s15, [#allocation3]  }
 0x1cc   :  { %116 = dma.done.wait [#allocation3], 16  }
 0x1cd   :  { %117 = vsyncadd [#allocation3], 4294967280 }
 0x1ce   :  { %80 = vsyncpa [#allocation3], 1 }

</bundles_post_ra>
